<compile_context>
chip_gen: v7x
topology: tpu7x:2x2x1
jax: 0.10.0
libtpu: 0.0.40
codegen_flags: <defaults>
</compile_context>

<pallas_src>
import functools

import jax
import jax.numpy as jnp
from jax.experimental import pallas as pl
from jax.experimental.pallas import tpu as pltpu

THRESH = 1.0
DECAY = 0.5

LANE = 128                         # lanes per vreg
NSUB = 8                           # sublanes per register-carried mem slab (1 vreg)
MAX_TCHUNK = 256                   # max timesteps per grid step (VMEM budget)
TARGET_BLOCK_ELEMS = 2048 * LANE   # ~1 MiB of f32 input per block


def _lif_kernel(x_ref, o_ref, mem_ref):
    """x_ref/o_ref: (TC, NS, 128) f32 VMEM; mem_ref: (1, NS, 128) f32 scratch."""
    # New feature tile starts at time-chunk 0: reset the membrane potential.
    @pl.when(pl.program_id(1) == 0)
    def _():
        mem_ref[...] = jnp.zeros_like(mem_ref)

    tc = x_ref.shape[0]
    ns = x_ref.shape[1]
    if tc <= 32:
        unroll = True              # fully unroll short time chunks
    elif tc % 8 == 0:
        unroll = 8
    elif tc % 4 == 0:
        unroll = 4
    elif tc % 2 == 0:
        unroll = 2
    else:
        unroll = 1

    zero_slab = jnp.zeros((1, NSUB, LANE), jnp.float32)   # hoisted broadcast

    # Independent recurrences per NSUB-sublane slab; each slab's mem is one
    # vreg carried in registers across the (unrolled) time loop.
    for j in range(ns // NSUB):
        sl = pl.ds(j * NSUB, NSUB)

        def body(t, mem, sl=sl):
            cur = x_ref[pl.ds(t, 1), sl, :]               # (1, NSUB, 128)
            mem = mem * DECAY + cur
            spk = mem >= THRESH                           # bool
            # NOTE: .to_sparse().to_dense() in the reference is an identity op.
            o_ref[pl.ds(t, 1), sl, :] = spk.astype(jnp.float32)
            return jnp.where(spk, zero_slab, mem)         # reset where spiked

        mem_ref[:, sl, :] = jax.lax.fori_loop(
            0, tc, body, mem_ref[:, sl, :], unroll=unroll)


def _round_up(a, b):
    return -(-a // b) * b


@jax.jit
def lif_forward(x):
    """x: float array of shape [..., T]. Returns binary float32 spikes, same shape."""
    x = x.astype(jnp.float32)
    orig_shape = x.shape
    T = orig_shape[-1]
    n = 1
    for d in orig_shape[:-1]:
        n *= d

    # ---- tiling choices --------------------------------------------------
    TC = T if T <= MAX_TCHUNK else MAX_TCHUNK          # timesteps per block
    Tp = _round_up(T, TC)                              # (no time pad if T<=256)

    G = -(-n // LANE)                                  # 128-lane feature groups
    G8 = _round_up(G, NSUB)
    # Feature-sublane tile per grid step: target ~TARGET_BLOCK_ELEMS elems per
    # block, capped at 128 sublanes; keep >=2 parallel tiles when there is
    # enough data (helps v7x shard the parallel axis over its 2 TensorCores).
    ns_target = max(NSUB, min(128, (TARGET_BLOCK_ELEMS // (TC * LANE)) // NSUB * NSUB))
    if G8 >= 2 * NSUB:
        half = max(NSUB, (G8 // 2) // NSUB * NSUB)
        NS = min(ns_target, half)
    else:
        NS = G8
    Gp = _round_up(G, NS)
    Np = Gp * LANE

    # ---- lay out as [Tp, Gp, 128] (time on rows, features on sublane/lane) --
    # TODO(synk): the feature/time transpose is still an XLA op in the wrapper
    # (one extra HBM pass each way); fusing it into the kernel via an in-kernel
    # XLU transpose of natural-layout blocks would cut HBM traffic further but
    # is left out here for lowering robustness.
    xf = jnp.pad(x.reshape(n, T), ((0, Np - n), (0, Tp - T)))
    xt = jnp.transpose(xf, (1, 0)).reshape(Tp, Gp, LANE)

    grid = (Gp // NS, Tp // TC)   # (feature tiles [parallel], time chunks [arbitrary])
    out = pl.pallas_call(
        _lif_kernel,
        out_shape=jax.ShapeDtypeStruct((Tp, Gp, LANE), jnp.float32),
        grid_spec=pltpu.PrefetchScalarGridSpec(
            num_scalar_prefetch=0,
            grid=grid,
            in_specs=[pl.BlockSpec((TC, NS, LANE), lambda i, k: (k, i, 0))],
            out_specs=pl.BlockSpec((TC, NS, LANE), lambda i, k: (k, i, 0)),
            scratch_shapes=[pltpu.VMEM((1, NS, LANE), jnp.float32)],
        ),
        compiler_params=pltpu.CompilerParams(
            dimension_semantics=("parallel", "arbitrary"),
        ),
    )(xt)

    out = out.reshape(Tp, Np)[:T, :n]                  # strip padding
    return jnp.transpose(out, (1, 0)).reshape(orig_shape)


def _lif_ref(x):
    """Pure-JAX reference mirroring the PyTorch loop."""
    x = x.astype(jnp.float32)
    T = x.shape[-1]
    mem = jnp.zeros(x.shape[:-1], jnp.float32)
    spikes = []
    for t in range(T):
        mem = mem * DECAY + x[..., t]
        spk = (mem - THRESH >= 0.0).astype(jnp.float32)
        mem = mem * (1.0 - spk)
        spikes.append(spk)
    return jnp.stack(spikes, axis=-1)


if __name__ == "__main__":
    key = jax.random.PRNGKey(0)
    # x: (batch=2, channels=4, spatial=16, T=16); last dim is time.
    x = jax.random.normal(key, (2, 4, 16, 16), dtype=jnp.float32) * 1.5

    y = jax.block_until_ready(lif_forward(x))
    y_ref = _lif_ref(x)

    assert y.shape == x.shape
    assert jnp.allclose(y, y_ref), "mismatch vs reference"
    print("KERNEL_OK")
</pallas_src>

<mosaic_0001>
module attributes {stable_mosaic.version = 11 : i64} {
  func.func @_lif_kernel(%arg0: i32, %arg1: i32, %arg2: memref<16x8x128xf32, #tpu.memory_space<vmem>>, %arg3: memref<16x8x128xf32, #tpu.memory_space<vmem>>, %arg4: memref<1x8x128xf32, #tpu.memory_space<vmem>>) attributes {dimension_semantics = [#tpu.dimension_semantics<parallel>, #tpu.dimension_semantics<arbitrary>], iteration_bounds = array<i64: 1, 1>, scalar_prefetch = 0 : i64, scratch_operands = 1 : i64, tpu.core_type = #tpu.core_type<tc>, window_params = [{transform_indices = @transform_0, window_bounds = array<i64: 16, 8, 128>}, {transform_indices = @transform_1, window_bounds = array<i64: 16, 8, 128>}]} {
    %c0_i32 = arith.constant 0 : i32
    %0 = arith.cmpi eq, %arg1, %c0_i32 : i32
    %1 = arith.extui %0 : i1 to i32
    %c0_i32_0 = arith.constant 0 : i32
    %2 = arith.cmpi ne, %1, %c0_i32_0 : i32
    scf.if %2 {
      %cst_103 = arith.constant 0.000000e+00 : f32
      %198 = vector.broadcast %cst_103 : f32 to vector<1x8x128xf32>
      %c0_104 = arith.constant 0 : index
      %c0_105 = arith.constant 0 : index
      %c0_106 = arith.constant 0 : index
      %199 = vector.load %arg4[%c0_104, %c0_105, %c0_106] : memref<1x8x128xf32, #tpu.memory_space<vmem>>, vector<1x8x128xf32>
      tpu.vector_store %arg4[%c0_104, %c0_105, %c0_106], %198 {strides = array<i32>} : memref<1x8x128xf32, #tpu.memory_space<vmem>>, vector<1x8x128xf32>,
    } else {
    }
    %cst = arith.constant 0.000000e+00 : f32
    %3 = vector.broadcast %cst : f32 to vector<1x8x128xf32>
    %c0 = arith.constant 0 : index
    %c0_1 = arith.constant 0 : index
    %c0_2 = arith.constant 0 : index
    %4 = vector.load %arg4[%c0, %c0_1, %c0_2] : memref<1x8x128xf32, #tpu.memory_space<vmem>>, vector<1x8x128xf32>
    %c0_i32_3 = arith.constant 0 : i32
    %5 = arith.index_cast %c0_i32_3 : i32 to index
    %c0_4 = arith.constant 0 : index
    %c0_5 = arith.constant 0 : index
    %6 = vector.load %arg2[%5, %c0_4, %c0_5] : memref<16x8x128xf32, #tpu.memory_space<vmem>>, vector<1x8x128xf32>
    %cst_6 = arith.constant 5.000000e-01 : f32
    %7 = vector.broadcast %cst_6 : f32 to vector<1x8x128xf32>
    %8 = arith.mulf %4, %7 : vector<1x8x128xf32>
    %9 = arith.addf %8, %6 : vector<1x8x128xf32>
    %cst_7 = arith.constant 1.000000e+00 : f32
    %10 = vector.broadcast %cst_7 : f32 to vector<1x8x128xf32>
    %11 = arith.cmpf oge, %9, %10 : vector<1x8x128xf32>
    %12 = arith.extui %11 : vector<1x8x128xi1> to vector<1x8x128xi32>
    %13 = arith.sitofp %12 : vector<1x8x128xi32> to vector<1x8x128xf32>
    %14 = arith.index_cast %c0_i32_3 : i32 to index
    %c0_8 = arith.constant 0 : index
    %c0_9 = arith.constant 0 : index
    %15 = vector.load %arg3[%14, %c0_8, %c0_9] : memref<16x8x128xf32, #tpu.memory_space<vmem>>, vector<1x8x128xf32>
    tpu.vector_store %arg3[%14, %c0_8, %c0_9], %13 {strides = array<i32>} : memref<16x8x128xf32, #tpu.memory_space<vmem>>, vector<1x8x128xf32>,
    %16 = arith.select %11, %3, %9 : vector<1x8x128xi1>, vector<1x8x128xf32>
    %c1_i32 = arith.constant 1 : i32
    %17 = arith.index_cast %c1_i32 : i32 to index
    %c0_10 = arith.constant 0 : index
    %c0_11 = arith.constant 0 : index
    %18 = vector.load %arg2[%17, %c0_10, %c0_11] : memref<16x8x128xf32, #tpu.memory_space<vmem>>, vector<1x8x128xf32>
    %cst_12 = arith.constant 5.000000e-01 : f32
    %19 = vector.broadcast %cst_12 : f32 to vector<1x8x128xf32>
    %20 = arith.mulf %16, %19 : vector<1x8x128xf32>
    %21 = arith.addf %20, %18 : vector<1x8x128xf32>
    %cst_13 = arith.constant 1.000000e+00 : f32
    %22 = vector.broadcast %cst_13 : f32 to vector<1x8x128xf32>
    %23 = arith.cmpf oge, %21, %22 : vector<1x8x128xf32>
    %24 = arith.extui %23 : vector<1x8x128xi1> to vector<1x8x128xi32>
    %25 = arith.sitofp %24 : vector<1x8x128xi32> to vector<1x8x128xf32>
    %26 = arith.index_cast %c1_i32 : i32 to index
    %c0_14 = arith.constant 0 : index
    %c0_15 = arith.constant 0 : index
    %27 = vector.load %arg3[%26, %c0_14, %c0_15] : memref<16x8x128xf32, #tpu.memory_space<vmem>>, vector<1x8x128xf32>
    tpu.vector_store %arg3[%26, %c0_14, %c0_15], %25 {strides = array<i32>} : memref<16x8x128xf32, #tpu.memory_space<vmem>>, vector<1x8x128xf32>,
    %28 = arith.select %23, %3, %21 : vector<1x8x128xi1>, vector<1x8x128xf32>
    %c2_i32 = arith.constant 2 : i32
    %29 = arith.index_cast %c2_i32 : i32 to index
    %c0_16 = arith.constant 0 : index
    %c0_17 = arith.constant 0 : index
    %30 = vector.load %arg2[%29, %c0_16, %c0_17] : memref<16x8x128xf32, #tpu.memory_space<vmem>>, vector<1x8x128xf32>
    %cst_18 = arith.constant 5.000000e-01 : f32
    %31 = vector.broadcast %cst_18 : f32 to vector<1x8x128xf32>
    %32 = arith.mulf %28, %31 : vector<1x8x128xf32>
    %33 = arith.addf %32, %30 : vector<1x8x128xf32>
    %cst_19 = arith.constant 1.000000e+00 : f32
    %34 = vector.broadcast %cst_19 : f32 to vector<1x8x128xf32>
    %35 = arith.cmpf oge, %33, %34 : vector<1x8x128xf32>
    %36 = arith.extui %35 : vector<1x8x128xi1> to vector<1x8x128xi32>
    %37 = arith.sitofp %36 : vector<1x8x128xi32> to vector<1x8x128xf32>
    %38 = arith.index_cast %c2_i32 : i32 to index
    %c0_20 = arith.constant 0 : index
    %c0_21 = arith.constant 0 : index
    %39 = vector.load %arg3[%38, %c0_20, %c0_21] : memref<16x8x128xf32, #tpu.memory_space<vmem>>, vector<1x8x128xf32>
    tpu.vector_store %arg3[%38, %c0_20, %c0_21], %37 {strides = array<i32>} : memref<16x8x128xf32, #tpu.memory_space<vmem>>, vector<1x8x128xf32>,
    %40 = arith.select %35, %3, %33 : vector<1x8x128xi1>, vector<1x8x128xf32>
    %c3_i32 = arith.constant 3 : i32
    %41 = arith.index_cast %c3_i32 : i32 to index
    %c0_22 = arith.constant 0 : index
    %c0_23 = arith.constant 0 : index
    %42 = vector.load %arg2[%41, %c0_22, %c0_23] : memref<16x8x128xf32, #tpu.memory_space<vmem>>, vector<1x8x128xf32>
    %cst_24 = arith.constant 5.000000e-01 : f32
    %43 = vector.broadcast %cst_24 : f32 to vector<1x8x128xf32>
    %44 = arith.mulf %40, %43 : vector<1x8x128xf32>
    %45 = arith.addf %44, %42 : vector<1x8x128xf32>
    %cst_25 = arith.constant 1.000000e+00 : f32
    %46 = vector.broadcast %cst_25 : f32 to vector<1x8x128xf32>
    %47 = arith.cmpf oge, %45, %46 : vector<1x8x128xf32>
    %48 = arith.extui %47 : vector<1x8x128xi1> to vector<1x8x128xi32>
    %49 = arith.sitofp %48 : vector<1x8x128xi32> to vector<1x8x128xf32>
    %50 = arith.index_cast %c3_i32 : i32 to index
    %c0_26 = arith.constant 0 : index
    %c0_27 = arith.constant 0 : index
    %51 = vector.load %arg3[%50, %c0_26, %c0_27] : memref<16x8x128xf32, #tpu.memory_space<vmem>>, vector<1x8x128xf32>
    tpu.vector_store %arg3[%50, %c0_26, %c0_27], %49 {strides = array<i32>} : memref<16x8x128xf32, #tpu.memory_space<vmem>>, vector<1x8x128xf32>,
    %52 = arith.select %47, %3, %45 : vector<1x8x128xi1>, vector<1x8x128xf32>
    %c4_i32 = arith.constant 4 : i32
    %53 = arith.index_cast %c4_i32 : i32 to index
    %c0_28 = arith.constant 0 : index
    %c0_29 = arith.constant 0 : index
    %54 = vector.load %arg2[%53, %c0_28, %c0_29] : memref<16x8x128xf32, #tpu.memory_space<vmem>>, vector<1x8x128xf32>
    %cst_30 = arith.constant 5.000000e-01 : f32
    %55 = vector.broadcast %cst_30 : f32 to vector<1x8x128xf32>
    %56 = arith.mulf %52, %55 : vector<1x8x128xf32>
    %57 = arith.addf %56, %54 : vector<1x8x128xf32>
    %cst_31 = arith.constant 1.000000e+00 : f32
    %58 = vector.broadcast %cst_31 : f32 to vector<1x8x128xf32>
    %59 = arith.cmpf oge, %57, %58 : vector<1x8x128xf32>
    %60 = arith.extui %59 : vector<1x8x128xi1> to vector<1x8x128xi32>
    %61 = arith.sitofp %60 : vector<1x8x128xi32> to vector<1x8x128xf32>
    %62 = arith.index_cast %c4_i32 : i32 to index
    %c0_32 = arith.constant 0 : index
    %c0_33 = arith.constant 0 : index
    %63 = vector.load %arg3[%62, %c0_32, %c0_33] : memref<16x8x128xf32, #tpu.memory_space<vmem>>, vector<1x8x128xf32>
    tpu.vector_store %arg3[%62, %c0_32, %c0_33], %61 {strides = array<i32>} : memref<16x8x128xf32, #tpu.memory_space<vmem>>, vector<1x8x128xf32>,
    %64 = arith.select %59, %3, %57 : vector<1x8x128xi1>, vector<1x8x128xf32>
    %c5_i32 = arith.constant 5 : i32
    %65 = arith.index_cast %c5_i32 : i32 to index
    %c0_34 = arith.constant 0 : index
    %c0_35 = arith.constant 0 : index
    %66 = vector.load %arg2[%65, %c0_34, %c0_35] : memref<16x8x128xf32, #tpu.memory_space<vmem>>, vector<1x8x128xf32>
    %cst_36 = arith.constant 5.000000e-01 : f32
    %67 = vector.broadcast %cst_36 : f32 to vector<1x8x128xf32>
    %68 = arith.mulf %64, %67 : vector<1x8x128xf32>
    %69 = arith.addf %68, %66 : vector<1x8x128xf32>
    %cst_37 = arith.constant 1.000000e+00 : f32
    %70 = vector.broadcast %cst_37 : f32 to vector<1x8x128xf32>
    %71 = arith.cmpf oge, %69, %70 : vector<1x8x128xf32>
    %72 = arith.extui %71 : vector<1x8x128xi1> to vector<1x8x128xi32>
    %73 = arith.sitofp %72 : vector<1x8x128xi32> to vector<1x8x128xf32>
    %74 = arith.index_cast %c5_i32 : i32 to index
    %c0_38 = arith.constant 0 : index
    %c0_39 = arith.constant 0 : index
    %75 = vector.load %arg3[%74, %c0_38, %c0_39] : memref<16x8x128xf32, #tpu.memory_space<vmem>>, vector<1x8x128xf32>
    tpu.vector_store %arg3[%74, %c0_38, %c0_39], %73 {strides = array<i32>} : memref<16x8x128xf32, #tpu.memory_space<vmem>>, vector<1x8x128xf32>,
    %76 = arith.select %71, %3, %69 : vector<1x8x128xi1>, vector<1x8x128xf32>
    %c6_i32 = arith.constant 6 : i32
    %77 = arith.index_cast %c6_i32 : i32 to index
    %c0_40 = arith.constant 0 : index
    %c0_41 = arith.constant 0 : index
    %78 = vector.load %arg2[%77, %c0_40, %c0_41] : memref<16x8x128xf32, #tpu.memory_space<vmem>>, vector<1x8x128xf32>
    %cst_42 = arith.constant 5.000000e-01 : f32
    %79 = vector.broadcast %cst_42 : f32 to vector<1x8x128xf32>
    %80 = arith.mulf %76, %79 : vector<1x8x128xf32>
    %81 = arith.addf %80, %78 : vector<1x8x128xf32>
    %cst_43 = arith.constant 1.000000e+00 : f32
    %82 = vector.broadcast %cst_43 : f32 to vector<1x8x128xf32>
    %83 = arith.cmpf oge, %81, %82 : vector<1x8x128xf32>
    %84 = arith.extui %83 : vector<1x8x128xi1> to vector<1x8x128xi32>
    %85 = arith.sitofp %84 : vector<1x8x128xi32> to vector<1x8x128xf32>
    %86 = arith.index_cast %c6_i32 : i32 to index
    %c0_44 = arith.constant 0 : index
    %c0_45 = arith.constant 0 : index
    %87 = vector.load %arg3[%86, %c0_44, %c0_45] : memref<16x8x128xf32, #tpu.memory_space<vmem>>, vector<1x8x128xf32>
    tpu.vector_store %arg3[%86, %c0_44, %c0_45], %85 {strides = array<i32>} : memref<16x8x128xf32, #tpu.memory_space<vmem>>, vector<1x8x128xf32>,
    %88 = arith.select %83, %3, %81 : vector<1x8x128xi1>, vector<1x8x128xf32>
    %c7_i32 = arith.constant 7 : i32
    %89 = arith.index_cast %c7_i32 : i32 to index
    %c0_46 = arith.constant 0 : index
    %c0_47 = arith.constant 0 : index
    %90 = vector.load %arg2[%89, %c0_46, %c0_47] : memref<16x8x128xf32, #tpu.memory_space<vmem>>, vector<1x8x128xf32>
    %cst_48 = arith.constant 5.000000e-01 : f32
    %91 = vector.broadcast %cst_48 : f32 to vector<1x8x128xf32>
    %92 = arith.mulf %88, %91 : vector<1x8x128xf32>
    %93 = arith.addf %92, %90 : vector<1x8x128xf32>
    %cst_49 = arith.constant 1.000000e+00 : f32
    %94 = vector.broadcast %cst_49 : f32 to vector<1x8x128xf32>
    %95 = arith.cmpf oge, %93, %94 : vector<1x8x128xf32>
    %96 = arith.extui %95 : vector<1x8x128xi1> to vector<1x8x128xi32>
    %97 = arith.sitofp %96 : vector<1x8x128xi32> to vector<1x8x128xf32>
    %98 = arith.index_cast %c7_i32 : i32 to index
    %c0_50 = arith.constant 0 : index
    %c0_51 = arith.constant 0 : index
    %99 = vector.load %arg3[%98, %c0_50, %c0_51] : memref<16x8x128xf32, #tpu.memory_space<vmem>>, vector<1x8x128xf32>
    tpu.vector_store %arg3[%98, %c0_50, %c0_51], %97 {strides = array<i32>} : memref<16x8x128xf32, #tpu.memory_space<vmem>>, vector<1x8x128xf32>,
    %100 = arith.select %95, %3, %93 : vector<1x8x128xi1>, vector<1x8x128xf32>
    %c8_i32 = arith.constant 8 : i32
    %101 = arith.index_cast %c8_i32 : i32 to index
    %c0_52 = arith.constant 0 : index
    %c0_53 = arith.constant 0 : index
    %102 = vector.load %arg2[%101, %c0_52, %c0_53] : memref<16x8x128xf32, #tpu.memory_space<vmem>>, vector<1x8x128xf32>
    %cst_54 = arith.constant 5.000000e-01 : f32
    %103 = vector.broadcast %cst_54 : f32 to vector<1x8x128xf32>
    %104 = arith.mulf %100, %103 : vector<1x8x128xf32>
    %105 = arith.addf %104, %102 : vector<1x8x128xf32>
    %cst_55 = arith.constant 1.000000e+00 : f32
    %106 = vector.broadcast %cst_55 : f32 to vector<1x8x128xf32>
    %107 = arith.cmpf oge, %105, %106 : vector<1x8x128xf32>
    %108 = arith.extui %107 : vector<1x8x128xi1> to vector<1x8x128xi32>
    %109 = arith.sitofp %108 : vector<1x8x128xi32> to vector<1x8x128xf32>
    %110 = arith.index_cast %c8_i32 : i32 to index
    %c0_56 = arith.constant 0 : index
    %c0_57 = arith.constant 0 : index
    %111 = vector.load %arg3[%110, %c0_56, %c0_57] : memref<16x8x128xf32, #tpu.memory_space<vmem>>, vector<1x8x128xf32>
    tpu.vector_store %arg3[%110, %c0_56, %c0_57], %109 {strides = array<i32>} : memref<16x8x128xf32, #tpu.memory_space<vmem>>, vector<1x8x128xf32>,
    %112 = arith.select %107, %3, %105 : vector<1x8x128xi1>, vector<1x8x128xf32>
    %c9_i32 = arith.constant 9 : i32
    %113 = arith.index_cast %c9_i32 : i32 to index
    %c0_58 = arith.constant 0 : index
    %c0_59 = arith.constant 0 : index
    %114 = vector.load %arg2[%113, %c0_58, %c0_59] : memref<16x8x128xf32, #tpu.memory_space<vmem>>, vector<1x8x128xf32>
    %cst_60 = arith.constant 5.000000e-01 : f32
    %115 = vector.broadcast %cst_60 : f32 to vector<1x8x128xf32>
    %116 = arith.mulf %112, %115 : vector<1x8x128xf32>
    %117 = arith.addf %116, %114 : vector<1x8x128xf32>
    %cst_61 = arith.constant 1.000000e+00 : f32
    %118 = vector.broadcast %cst_61 : f32 to vector<1x8x128xf32>
    %119 = arith.cmpf oge, %117, %118 : vector<1x8x128xf32>
    %120 = arith.extui %119 : vector<1x8x128xi1> to vector<1x8x128xi32>
    %121 = arith.sitofp %120 : vector<1x8x128xi32> to vector<1x8x128xf32>
    %122 = arith.index_cast %c9_i32 : i32 to index
    %c0_62 = arith.constant 0 : index
    %c0_63 = arith.constant 0 : index
    %123 = vector.load %arg3[%122, %c0_62, %c0_63] : memref<16x8x128xf32, #tpu.memory_space<vmem>>, vector<1x8x128xf32>
    tpu.vector_store %arg3[%122, %c0_62, %c0_63], %121 {strides = array<i32>} : memref<16x8x128xf32, #tpu.memory_space<vmem>>, vector<1x8x128xf32>,
    %124 = arith.select %119, %3, %117 : vector<1x8x128xi1>, vector<1x8x128xf32>
    %c10_i32 = arith.constant 10 : i32
    %125 = arith.index_cast %c10_i32 : i32 to index
    %c0_64 = arith.constant 0 : index
    %c0_65 = arith.constant 0 : index
    %126 = vector.load %arg2[%125, %c0_64, %c0_65] : memref<16x8x128xf32, #tpu.memory_space<vmem>>, vector<1x8x128xf32>
    %cst_66 = arith.constant 5.000000e-01 : f32
    %127 = vector.broadcast %cst_66 : f32 to vector<1x8x128xf32>
    %128 = arith.mulf %124, %127 : vector<1x8x128xf32>
    %129 = arith.addf %128, %126 : vector<1x8x128xf32>
    %cst_67 = arith.constant 1.000000e+00 : f32
    %130 = vector.broadcast %cst_67 : f32 to vector<1x8x128xf32>
    %131 = arith.cmpf oge, %129, %130 : vector<1x8x128xf32>
    %132 = arith.extui %131 : vector<1x8x128xi1> to vector<1x8x128xi32>
    %133 = arith.sitofp %132 : vector<1x8x128xi32> to vector<1x8x128xf32>
    %134 = arith.index_cast %c10_i32 : i32 to index
    %c0_68 = arith.constant 0 : index
    %c0_69 = arith.constant 0 : index
    %135 = vector.load %arg3[%134, %c0_68, %c0_69] : memref<16x8x128xf32, #tpu.memory_space<vmem>>, vector<1x8x128xf32>
    tpu.vector_store %arg3[%134, %c0_68, %c0_69], %133 {strides = array<i32>} : memref<16x8x128xf32, #tpu.memory_space<vmem>>, vector<1x8x128xf32>,
    %136 = arith.select %131, %3, %129 : vector<1x8x128xi1>, vector<1x8x128xf32>
    %c11_i32 = arith.constant 11 : i32
    %137 = arith.index_cast %c11_i32 : i32 to index
    %c0_70 = arith.constant 0 : index
    %c0_71 = arith.constant 0 : index
    %138 = vector.load %arg2[%137, %c0_70, %c0_71] : memref<16x8x128xf32, #tpu.memory_space<vmem>>, vector<1x8x128xf32>
    %cst_72 = arith.constant 5.000000e-01 : f32
    %139 = vector.broadcast %cst_72 : f32 to vector<1x8x128xf32>
    %140 = arith.mulf %136, %139 : vector<1x8x128xf32>
    %141 = arith.addf %140, %138 : vector<1x8x128xf32>
    %cst_73 = arith.constant 1.000000e+00 : f32
    %142 = vector.broadcast %cst_73 : f32 to vector<1x8x128xf32>
    %143 = arith.cmpf oge, %141, %142 : vector<1x8x128xf32>
    %144 = arith.extui %143 : vector<1x8x128xi1> to vector<1x8x128xi32>
    %145 = arith.sitofp %144 : vector<1x8x128xi32> to vector<1x8x128xf32>
    %146 = arith.index_cast %c11_i32 : i32 to index
    %c0_74 = arith.constant 0 : index
    %c0_75 = arith.constant 0 : index
    %147 = vector.load %arg3[%146, %c0_74, %c0_75] : memref<16x8x128xf32, #tpu.memory_space<vmem>>, vector<1x8x128xf32>
    tpu.vector_store %arg3[%146, %c0_74, %c0_75], %145 {strides = array<i32>} : memref<16x8x128xf32, #tpu.memory_space<vmem>>, vector<1x8x128xf32>,
    %148 = arith.select %143, %3, %141 : vector<1x8x128xi1>, vector<1x8x128xf32>
    %c12_i32 = arith.constant 12 : i32
    %149 = arith.index_cast %c12_i32 : i32 to index
    %c0_76 = arith.constant 0 : index
    %c0_77 = arith.constant 0 : index
    %150 = vector.load %arg2[%149, %c0_76, %c0_77] : memref<16x8x128xf32, #tpu.memory_space<vmem>>, vector<1x8x128xf32>
    %cst_78 = arith.constant 5.000000e-01 : f32
    %151 = vector.broadcast %cst_78 : f32 to vector<1x8x128xf32>
    %152 = arith.mulf %148, %151 : vector<1x8x128xf32>
    %153 = arith.addf %152, %150 : vector<1x8x128xf32>
    %cst_79 = arith.constant 1.000000e+00 : f32
    %154 = vector.broadcast %cst_79 : f32 to vector<1x8x128xf32>
    %155 = arith.cmpf oge, %153, %154 : vector<1x8x128xf32>
    %156 = arith.extui %155 : vector<1x8x128xi1> to vector<1x8x128xi32>
    %157 = arith.sitofp %156 : vector<1x8x128xi32> to vector<1x8x128xf32>
    %158 = arith.index_cast %c12_i32 : i32 to index
    %c0_80 = arith.constant 0 : index
    %c0_81 = arith.constant 0 : index
    %159 = vector.load %arg3[%158, %c0_80, %c0_81] : memref<16x8x128xf32, #tpu.memory_space<vmem>>, vector<1x8x128xf32>
    tpu.vector_store %arg3[%158, %c0_80, %c0_81], %157 {strides = array<i32>} : memref<16x8x128xf32, #tpu.memory_space<vmem>>, vector<1x8x128xf32>,
    %160 = arith.select %155, %3, %153 : vector<1x8x128xi1>, vector<1x8x128xf32>
    %c13_i32 = arith.constant 13 : i32
    %161 = arith.index_cast %c13_i32 : i32 to index
    %c0_82 = arith.constant 0 : index
    %c0_83 = arith.constant 0 : index
    %162 = vector.load %arg2[%161, %c0_82, %c0_83] : memref<16x8x128xf32, #tpu.memory_space<vmem>>, vector<1x8x128xf32>
    %cst_84 = arith.constant 5.000000e-01 : f32
    %163 = vector.broadcast %cst_84 : f32 to vector<1x8x128xf32>
    %164 = arith.mulf %160, %163 : vector<1x8x128xf32>
    %165 = arith.addf %164, %162 : vector<1x8x128xf32>
    %cst_85 = arith.constant 1.000000e+00 : f32
    %166 = vector.broadcast %cst_85 : f32 to vector<1x8x128xf32>
    %167 = arith.cmpf oge, %165, %166 : vector<1x8x128xf32>
    %168 = arith.extui %167 : vector<1x8x128xi1> to vector<1x8x128xi32>
    %169 = arith.sitofp %168 : vector<1x8x128xi32> to vector<1x8x128xf32>
    %170 = arith.index_cast %c13_i32 : i32 to index
    %c0_86 = arith.constant 0 : index
    %c0_87 = arith.constant 0 : index
    %171 = vector.load %arg3[%170, %c0_86, %c0_87] : memref<16x8x128xf32, #tpu.memory_space<vmem>>, vector<1x8x128xf32>
    tpu.vector_store %arg3[%170, %c0_86, %c0_87], %169 {strides = array<i32>} : memref<16x8x128xf32, #tpu.memory_space<vmem>>, vector<1x8x128xf32>,
    %172 = arith.select %167, %3, %165 : vector<1x8x128xi1>, vector<1x8x128xf32>
    %c14_i32 = arith.constant 14 : i32
    %173 = arith.index_cast %c14_i32 : i32 to index
    %c0_88 = arith.constant 0 : index
    %c0_89 = arith.constant 0 : index
    %174 = vector.load %arg2[%173, %c0_88, %c0_89] : memref<16x8x128xf32, #tpu.memory_space<vmem>>, vector<1x8x128xf32>
    %cst_90 = arith.constant 5.000000e-01 : f32
    %175 = vector.broadcast %cst_90 : f32 to vector<1x8x128xf32>
    %176 = arith.mulf %172, %175 : vector<1x8x128xf32>
    %177 = arith.addf %176, %174 : vector<1x8x128xf32>
    %cst_91 = arith.constant 1.000000e+00 : f32
    %178 = vector.broadcast %cst_91 : f32 to vector<1x8x128xf32>
    %179 = arith.cmpf oge, %177, %178 : vector<1x8x128xf32>
    %180 = arith.extui %179 : vector<1x8x128xi1> to vector<1x8x128xi32>
    %181 = arith.sitofp %180 : vector<1x8x128xi32> to vector<1x8x128xf32>
    %182 = arith.index_cast %c14_i32 : i32 to index
    %c0_92 = arith.constant 0 : index
    %c0_93 = arith.constant 0 : index
    %183 = vector.load %arg3[%182, %c0_92, %c0_93] : memref<16x8x128xf32, #tpu.memory_space<vmem>>, vector<1x8x128xf32>
    tpu.vector_store %arg3[%182, %c0_92, %c0_93], %181 {strides = array<i32>} : memref<16x8x128xf32, #tpu.memory_space<vmem>>, vector<1x8x128xf32>,
    %184 = arith.select %179, %3, %177 : vector<1x8x128xi1>, vector<1x8x128xf32>
    %c15_i32 = arith.constant 15 : i32
    %185 = arith.index_cast %c15_i32 : i32 to index
    %c0_94 = arith.constant 0 : index
    %c0_95 = arith.constant 0 : index
    %186 = vector.load %arg2[%185, %c0_94, %c0_95] : memref<16x8x128xf32, #tpu.memory_space<vmem>>, vector<1x8x128xf32>
    %cst_96 = arith.constant 5.000000e-01 : f32
    %187 = vector.broadcast %cst_96 : f32 to vector<1x8x128xf32>
    %188 = arith.mulf %184, %187 : vector<1x8x128xf32>
    %189 = arith.addf %188, %186 : vector<1x8x128xf32>
    %cst_97 = arith.constant 1.000000e+00 : f32
    %190 = vector.broadcast %cst_97 : f32 to vector<1x8x128xf32>
    %191 = arith.cmpf oge, %189, %190 : vector<1x8x128xf32>
    %192 = arith.extui %191 : vector<1x8x128xi1> to vector<1x8x128xi32>
    %193 = arith.sitofp %192 : vector<1x8x128xi32> to vector<1x8x128xf32>
    %194 = arith.index_cast %c15_i32 : i32 to index
    %c0_98 = arith.constant 0 : index
    %c0_99 = arith.constant 0 : index
    %195 = vector.load %arg3[%194, %c0_98, %c0_99] : memref<16x8x128xf32, #tpu.memory_space<vmem>>, vector<1x8x128xf32>
    tpu.vector_store %arg3[%194, %c0_98, %c0_99], %193 {strides = array<i32>} : memref<16x8x128xf32, #tpu.memory_space<vmem>>, vector<1x8x128xf32>,
    %196 = arith.select %191, %3, %189 : vector<1x8x128xi1>, vector<1x8x128xf32>
    %c16_i32 = arith.constant 16 : i32
    %c0_100 = arith.constant 0 : index
    %c0_101 = arith.constant 0 : index
    %c0_102 = arith.constant 0 : index
    %197 = vector.load %arg4[%c0_100, %c0_101, %c0_102] : memref<1x8x128xf32, #tpu.memory_space<vmem>>, vector<1x8x128xf32>
    tpu.vector_store %arg4[%c0_100, %c0_101, %c0_102], %196 {strides = array<i32>} : memref<1x8x128xf32, #tpu.memory_space<vmem>>, vector<1x8x128xf32>,
    return
  }
  func.func @transform_0(%arg0: i32, %arg1: i32) -> (i32, i32, i32) {
    %c0_i32 = arith.constant 0 : i32
    %c0_i32_0 = arith.constant 0 : i32
    return %arg1, %arg0, %c0_i32 : i32, i32, i32
  }
  func.func @transform_1(%arg0: i32, %arg1: i32) -> (i32, i32, i32) {
    %c0_i32 = arith.constant 0 : i32
    %c0_i32_0 = arith.constant 0 : i32
    return %arg1, %arg0, %c0_i32 : i32, i32, i32
  }
}

</mosaic_0001>

<bundles_post_ra>
// kernel: lif_forward.1
= control target key start
LH: loop header
LB: loop body
LE: loop exit
PB: predicated region body
PF: predicated region fallthrough
CT: control target
= control target key end

     0   :  { %v224_v1 = vmov 0.0   ;;  %s347_s0 = inlined_call_operand.vmem [shape: f32[16,8,128], index: 0, kind: input, shape index: {}]   ;;  %s348_s1 = inlined_call_operand.vmem [shape: f32[16,8,128], index: 1, kind: output, shape index: {}]  }
   0x1   :  { %v14_v0 = vld [vmem:[%s347_s0] sm:$0xff]  ;;  %v178_v4 = vld [vmem:[%s347_s0 + $0x8] sm:$0xff]  ;;  %v181_v9 = vld [vmem:[%s347_s0 + $0x10] sm:$0xff] }
   0x2   :  { %vm17_vm0 = vcmp.ge.f32.partialorder %v14_v0, 1.0  ;;  %v184_v14 = vld [vmem:[%s347_s0 + $0x18] sm:$0xff]  ;;  %v187_v19 = vld [vmem:[%s347_s0 + $0x20] sm:$0xff]  ;;  %v190_v24 = vld [vmem:[%s347_s0 + $0x28] sm:$0xff] }
   0x3   :  { %v177_v2 = vsel %vm17_vm0, 1.0, %v224_v1  ;;  %v21_v3 = vsel %vm17_vm0, 0.0, %v14_v0  ;;  %v193_v29 = vld [vmem:[%s347_s0 + $0x30] sm:$0xff]  ;;  %v196_v34 = vld [vmem:[%s347_s0 + $0x38] sm:$0xff]  ;;  %v199_v39 = vld [vmem:[%s347_s0 + $0x40] sm:$0xff] }
   0x4   :  { %20 = vst [vmem:[%s348_s1] sm:$0xff] %v177_v2  ;;  %v24_v5 = vmul.f32 0.5, %v21_v3  ;;  %v202_v44 = vld [vmem:[%s347_s0 + $0x48] sm:$0xff]  ;;  %v205_v49 = vld [vmem:[%s347_s0 + $0x50] sm:$0xff]  ;;  %v208_v54 = vld [vmem:[%s347_s0 + $0x58] sm:$0xff] }
   0x5   :  { %v211_v59 = vld [vmem:[%s347_s0 + $0x60] sm:$0xff]  ;;  %v214_v0 = vld [vmem:[%s347_s0 + $0x68] sm:$0xff] }
   0x6   :  { %v25_v6 = vadd.f32 %v178_v4, %v24_v5 }
   0x8   :  { %vm26_vm1 = vcmp.ge.f32.partialorder %v25_v6, 1.0 }
   0x9   :  { %v179_v7 = vsel %vm26_vm1, 1.0, %v224_v1  ;;  %v31_v8 = vsel %vm26_vm1, 0.0, %v25_v6  ;;  %v217_v6 = vld [vmem:[%s347_s0 + $0x70] sm:$0xff] }
   0xa   :  { %180 = vst [vmem:[%s348_s1 + $0x8] sm:$0xff] %v179_v7  ;;  %v34_v10 = vmul.f32 0.5, %v31_v8 }
   0xc   :  { %v35_v11 = vadd.f32 %v181_v9, %v34_v10 }
   0xe   :  { %vm36_vm2 = vcmp.ge.f32.partialorder %v35_v11, 1.0 }
   0xf   :  { %v182_v12 = vsel %vm36_vm2, 1.0, %v224_v1  ;;  %v41_v13 = vsel %vm36_vm2, 0.0, %v35_v11  ;;  %v220_v11 = vld [vmem:[%s347_s0 + $0x78] sm:$0xff] }
  0x10   :  { %183 = vst [vmem:[%s348_s1 + $0x10] sm:$0xff] %v182_v12  ;;  %v44_v15 = vmul.f32 0.5, %v41_v13 }
  0x12   :  { %v45_v16 = vadd.f32 %v184_v14, %v44_v15 }
  0x14   :  { %vm46_vm3 = vcmp.ge.f32.partialorder %v45_v16, 1.0 }
  0x15   :  { %v185_v17 = vsel %vm46_vm3, 1.0, %v224_v1  ;;  %v51_v18 = vsel %vm46_vm3, 0.0, %v45_v16 }
  0x16   :  { %186 = vst [vmem:[%s348_s1 + $0x18] sm:$0xff] %v185_v17  ;;  %v54_v20 = vmul.f32 0.5, %v51_v18 }
  0x18   :  { %v55_v21 = vadd.f32 %v187_v19, %v54_v20 }
  0x1a   :  { %vm56_vm4 = vcmp.ge.f32.partialorder %v55_v21, 1.0 }
  0x1b   :  { %v188_v22 = vsel %vm56_vm4, 1.0, %v224_v1  ;;  %v61_v23 = vsel %vm56_vm4, 0.0, %v55_v21 }
  0x1c   :  { %189 = vst [vmem:[%s348_s1 + $0x20] sm:$0xff] %v188_v22  ;;  %v64_v25 = vmul.f32 0.5, %v61_v23 }
  0x1e   :  { %v65_v26 = vadd.f32 %v190_v24, %v64_v25 }
  0x20   :  { %vm66_vm5 = vcmp.ge.f32.partialorder %v65_v26, 1.0 }
  0x21   :  { %v191_v27 = vsel %vm66_vm5, 1.0, %v224_v1  ;;  %v71_v28 = vsel %vm66_vm5, 0.0, %v65_v26 }
  0x22   :  { %192 = vst [vmem:[%s348_s1 + $0x28] sm:$0xff] %v191_v27  ;;  %v74_v30 = vmul.f32 0.5, %v71_v28 }
  0x24   :  { %v75_v31 = vadd.f32 %v193_v29, %v74_v30 }
  0x26   :  { %vm76_vm6 = vcmp.ge.f32.partialorder %v75_v31, 1.0 }
  0x27   :  { %v194_v32 = vsel %vm76_vm6, 1.0, %v224_v1  ;;  %v81_v33 = vsel %vm76_vm6, 0.0, %v75_v31 }
  0x28   :  { %195 = vst [vmem:[%s348_s1 + $0x30] sm:$0xff] %v194_v32  ;;  %v84_v35 = vmul.f32 0.5, %v81_v33 }
  0x2a   :  { %v85_v36 = vadd.f32 %v196_v34, %v84_v35 }
  0x2c   :  { %vm86_vm7 = vcmp.ge.f32.partialorder %v85_v36, 1.0 }
  0x2d   :  { %v197_v37 = vsel %vm86_vm7, 1.0, %v224_v1  ;;  %v91_v38 = vsel %vm86_vm7, 0.0, %v85_v36 }
  0x2e   :  { %198 = vst [vmem:[%s348_s1 + $0x38] sm:$0xff] %v197_v37  ;;  %v94_v40 = vmul.f32 0.5, %v91_v38 }
  0x30   :  { %v95_v41 = vadd.f32 %v199_v39, %v94_v40 }
  0x32   :  { %vm96_vm8 = vcmp.ge.f32.partialorder %v95_v41, 1.0 }
  0x33   :  { %v200_v42 = vsel %vm96_vm8, 1.0, %v224_v1  ;;  %v101_v43 = vsel %vm96_vm8, 0.0, %v95_v41 }
  0x34   :  { %201 = vst [vmem:[%s348_s1 + $0x40] sm:$0xff] %v200_v42  ;;  %v104_v45 = vmul.f32 0.5, %v101_v43 }
  0x36   :  { %v105_v46 = vadd.f32 %v202_v44, %v104_v45 }
  0x38   :  { %vm106_vm9 = vcmp.ge.f32.partialorder %v105_v46, 1.0 }
  0x39   :  { %v203_v47 = vsel %vm106_vm9, 1.0, %v224_v1  ;;  %v111_v48 = vsel %vm106_vm9, 0.0, %v105_v46 }
  0x3a   :  { %204 = vst [vmem:[%s348_s1 + $0x48] sm:$0xff] %v203_v47  ;;  %v114_v50 = vmul.f32 0.5, %v111_v48 }
  0x3c   :  { %v115_v51 = vadd.f32 %v205_v49, %v114_v50 }
  0x3e   :  { %vm116_vm10 = vcmp.ge.f32.partialorder %v115_v51, 1.0 }
  0x3f   :  { %v206_v52 = vsel %vm116_vm10, 1.0, %v224_v1  ;;  %v121_v53 = vsel %vm116_vm10, 0.0, %v115_v51 }
  0x40   :  { %207 = vst [vmem:[%s348_s1 + $0x50] sm:$0xff] %v206_v52  ;;  %v124_v55 = vmul.f32 0.5, %v121_v53 }
  0x42   :  { %v125_v56 = vadd.f32 %v208_v54, %v124_v55 }
  0x44   :  { %vm126_vm11 = vcmp.ge.f32.partialorder %v125_v56, 1.0 }
  0x45   :  { %v209_v57 = vsel %vm126_vm11, 1.0, %v224_v1  ;;  %v131_v58 = vsel %vm126_vm11, 0.0, %v125_v56 }
  0x46   :  { %210 = vst [vmem:[%s348_s1 + $0x58] sm:$0xff] %v209_v57  ;;  %v134_v60 = vmul.f32 0.5, %v131_v58 }
  0x48   :  { %v135_v61 = vadd.f32 %v211_v59, %v134_v60 }
  0x4a   :  { %vm136_vm12 = vcmp.ge.f32.partialorder %v135_v61, 1.0 }
  0x4b   :  { %v212_v62 = vsel %vm136_vm12, 1.0, %v224_v1  ;;  %v141_v63 = vsel %vm136_vm12, 0.0, %v135_v61 }
  0x4c   :  { %213 = vst [vmem:[%s348_s1 + $0x60] sm:$0xff] %v212_v62  ;;  %v144_v2 = vmul.f32 0.5, %v141_v63 }
  0x4e   :  { %v145_v3 = vadd.f32 %v214_v0, %v144_v2 }
  0x50   :  { %vm146_vm13 = vcmp.ge.f32.partialorder %v145_v3, 1.0 }
  0x51   :  { %v215_v4 = vsel %vm146_vm13, 1.0, %v224_v1  ;;  %v151_v5 = vsel %vm146_vm13, 0.0, %v145_v3 }
  0x52   :  { %216 = vst [vmem:[%s348_s1 + $0x68] sm:$0xff] %v215_v4  ;;  %v154_v7 = vmul.f32 0.5, %v151_v5 }
  0x54   :  { %v155_v8 = vadd.f32 %v217_v6, %v154_v7 }
  0x56   :  { %vm156_vm14 = vcmp.ge.f32.partialorder %v155_v8, 1.0 }
  0x57   :  { %v218_v9 = vsel %vm156_vm14, 1.0, %v224_v1  ;;  %v161_v10 = vsel %vm156_vm14, 0.0, %v155_v8 }
  0x58   :  { %219 = vst [vmem:[%s348_s1 + $0x70] sm:$0xff] %v218_v9  ;;  %v164_v12 = vmul.f32 0.5, %v161_v10 }
  0x5a   :  { %v165_v13 = vadd.f32 %v220_v11, %v164_v12 }
  0x5c   :  { %vm166_vm15 = vcmp.ge.f32.partialorder %v165_v13, 1.0 }
  0x5d   :  { %v221_v14 = vsel %vm166_vm15, 1.0, %v224_v1 }
  0x5e   :  { %222 = vst [vmem:[%s348_s1 + $0x78] sm:$0xff] %v221_v14 }

</bundles_post_ra>
